<compile_context>
chip_gen: v7x
topology: tpu7x:2x2x1
jax: 0.10.0
libtpu: 0.0.40
codegen_flags: <defaults>
</compile_context>

<pallas_src>
import functools

import jax
import jax.numpy as jnp
from jax.experimental import pallas as pl
from jax.experimental.pallas import tpu as pltpu

_NEG_BIG = -1e30   # "minus infinity" that stays NaN-safe under subtraction
_LANE = 128        # TPU lane width
_SUBLANE = 8       # f32 sublane tile


def _round_up(x, m):
    return (x + m - 1) // m * m


def _vmem_capacity_bytes():
    try:
        return int(pltpu.get_tpu_info().vmem_capacity_bytes)
    except Exception:
        return 64 << 20   # conservative fallback (v7x physical VMEM per TC)


# ---------------------------------------------------------------------------
# main kernel: MXU scores over H + online (streaming) softmax over time
# ---------------------------------------------------------------------------
def _attn_softmax_kernel(q_ref, enc_ref, out_ref, m_ref, l_ref, mloc_ref, *,
                         t_actual, t_tile, n_t, needs_mask):
    # q_ref:    (1, tb, H)      query (already Wa-projected for 'general')
    # enc_ref:  (tb, tt, H)     current time tile of encoder_outputs
    # out_ref:  (1, tb, Tp)     resident output block (same block for all t)
    # m_ref:    (tb, 1) f32     running row max
    # l_ref:    (tb, 1) f32     running (rescaled) sum of exp
    # mloc_ref: (nT, tb, 1) f32 per-tile local maxes
    t_idx = pl.program_id(1)
    last = pl.num_programs(1) - 1

    @pl.when(t_idx == 0)
    def _init():
        m_ref[...] = jnp.full(m_ref.shape, _NEG_BIG, dtype=jnp.float32)
        l_ref[...] = jnp.zeros_like(l_ref)

    # (tb, 1, H) x (tb, tt, H) -> (tb, 1, tt): H reduction on the MXU, f32 acc.
    q3 = q_ref[0][:, None, :]
    s = jnp.einsum("bqh,bkh->bqk", q3, enc_ref[...],
                   preferred_element_type=jnp.float32)[:, 0, :]   # (tb, tt)

    col = pl.multiple_of(t_idx * t_tile, _LANE)

    def accumulate(scores):
        # per-tile exp happens here, in the loop, hidden under the next DMA
        m_t = jnp.max(scores, axis=-1, keepdims=True)                 # (tb,1)
        e = jnp.exp(scores - m_t)                                     # (tb,tt)
        out_ref[0, :, pl.ds(col, t_tile)] = e                         # lane-dense
        mloc_ref[t_idx] = m_t
        m_new = jnp.maximum(m_ref[...], m_t)
        l_ref[...] = (l_ref[...] * jnp.exp(m_ref[...] - m_new)
                      + jnp.exp(m_t - m_new)
                      * jnp.sum(e, axis=-1, keepdims=True))
        m_ref[...] = m_new

    if needs_mask:
        # only the last time tile can be partial -> mask only there
        @pl.when(t_idx != last)
        def _full_tile():
            accumulate(s)

        @pl.when(t_idx == last)
        def _partial_tile():
            pos = col + jax.lax.broadcasted_iota(jnp.int32, s.shape, 1)
            accumulate(jnp.where(pos < t_actual, s, _NEG_BIG))
    else:
        accumulate(s)

    @pl.when(t_idx == last)
    def _finalize():
        l = l_ref[...]
        inv = pl.reciprocal(l, approx=True)            # EUP
        inv = inv * (2.0 - l * inv)                    # one Newton step -> ~f32
        m_fin = m_ref[...]

        def rescale(t, carry):                         # chunked per-tile rescale
            c = pl.multiple_of(t * t_tile, _LANE)
            scale = jnp.exp(mloc_ref[t] - m_fin) * inv            # (tb,1)
            out_ref[0, :, pl.ds(c, t_tile)] = (
                out_ref[0, :, pl.ds(c, t_tile)] * scale)
            return carry

        jax.lax.fori_loop(0, n_t, rescale, 0, unroll=(n_t <= 8))


def _choose_tiling(B, T, H, itemsize):
    vmem = _vmem_capacity_bytes()
    # keep the double-buffered encoder tile within ~1/4 of physical VMEM
    enc_budget = max(4 << 20, min(24 << 20, vmem // 4))

    # batch tile: prefer a full sublane tile (8), but guarantee >=2 steps on
    # the "parallel" batch axis for small B so both v7x TensorCores get work.
    if B >= 2 * _SUBLANE:
        tb = _SUBLANE
    elif B >= 2:
        tb = -(-B // 2)          # ceil(B/2) -> exactly 2 batch tiles
    else:
        tb = 1
    # large-H safety: shrink tb before the 128-lane floor can blow the budget
    while tb > 1 and enc_budget // (2 * tb * H * itemsize) < _LANE:
        tb = max(1, tb // 2)

    tt = enc_budget // (2 * tb * H * itemsize)
    tt = max(_LANE, min(2048, (tt // _LANE) * _LANE))
    tt = min(tt, _round_up(T, _LANE))
    return tb, tt


def _vmem_limit_bytes(tb, tt, H, Tp, n_t, itemsize):
    enc = 2 * tb * tt * H * itemsize              # double-buffered enc tiles
    out = 2 * tb * Tp * 4                         # double-buffered output row
    q = 2 * tb * H * itemsize
    scratch = (2 + n_t) * _SUBLANE * _LANE * 4    # padded tiny scratches
    need = enc + out + q + scratch + (4 << 20)    # + compiler headroom
    phys = _vmem_capacity_bytes()
    return int(min(max(32 << 20, need), max(phys - (8 << 20), need)))


def _attention_softmax(query, encoder_outputs):
    """softmax_t( einsum('bth,bh->bt', encoder_outputs, query) ) via Pallas."""
    B, T, H = encoder_outputs.shape
    assert query.shape == (B, H)
    itemsize = jnp.dtype(encoder_outputs.dtype).itemsize

    tb, tt = _choose_tiling(B, T, H, itemsize)
    nB = pl.cdiv(B, tb)
    Bp = nB * tb
    nT = pl.cdiv(T, tt)
    Tp = nT * tt

    # only the tiny query gets padded/reshaped; encoder_outputs stays as-is
    q_p = jnp.pad(query, ((0, Bp - B), (0, 0))).reshape(nB, tb, H)

    kernel = functools.partial(_attn_softmax_kernel, t_actual=T, t_tile=tt,
                               n_t=nT, needs_mask=(T % tt != 0))

    out = pl.pallas_call(
        kernel,
        out_shape=jax.ShapeDtypeStruct((nB, tb, Tp), jnp.float32),
        grid_spec=pltpu.PrefetchScalarGridSpec(
            num_scalar_prefetch=0,
            grid=(nB, nT),
            in_specs=[
                pl.BlockSpec((1, tb, H), lambda b, t: (b, 0, 0)),
                pl.BlockSpec((tb, tt, H), lambda b, t: (b, t, 0)),
            ],
            out_specs=pl.BlockSpec((1, tb, Tp), lambda b, t: (b, 0, 0)),
            scratch_shapes=[pltpu.VMEM((tb, 1), jnp.float32),
                            pltpu.VMEM((tb, 1), jnp.float32),
                            pltpu.VMEM((nT, tb, 1), jnp.float32)],
        ),
        compiler_params=pltpu.CompilerParams(
            dimension_semantics=("parallel", "arbitrary"),
            vmem_limit_bytes=_vmem_limit_bytes(tb, tt, H, Tp, nT, itemsize)),
    )(q_p, encoder_outputs)

    return out.reshape(Bp, Tp)[:B, :T]


# ---------------------------------------------------------------------------
# Wa projection for method='general' (runs exactly once; bounded VMEM tiles)
# ---------------------------------------------------------------------------
def _wa_project_kernel(h_ref, wa_ref, out_ref):
    # nn.Linear(H, H, bias=False): y = x @ Wa.weight.T  -- contract Wa's input
    # axis (dim 1) directly so no transposed weight copy is materialized.
    out_ref[...] = jax.lax.dot_general(
        h_ref[...], wa_ref[...],
        dimension_numbers=(((1,), (1,)), ((), ())),
        preferred_element_type=jnp.float32).astype(out_ref.dtype)


def _wa_project(last_hidden, wa_weight):
    B, H = last_hidden.shape
    itemsize = jnp.dtype(wa_weight.dtype).itemsize
    Bp = _round_up(B, _SUBLANE)
    x_p = jnp.pad(last_hidden, ((0, Bp - B), (0, 0)))

    if H <= _LANE:
        tn = H
    else:
        # keep the double-buffered (tn, H) weight tile around <= 4 MiB
        tn = ((4 << 20) // (2 * H * itemsize)) // _LANE * _LANE
        tn = max(_LANE, min(512, tn))

    out = pl.pallas_call(
        _wa_project_kernel,
        out_shape=jax.ShapeDtypeStruct((Bp, H), last_hidden.dtype),
        grid_spec=pltpu.PrefetchScalarGridSpec(
            num_scalar_prefetch=0,
            grid=(pl.cdiv(H, tn),),
            in_specs=[pl.BlockSpec((Bp, H), lambda j: (0, 0)),
                      pl.BlockSpec((tn, H), lambda j: (j, 0))],
            out_specs=pl.BlockSpec((Bp, tn), lambda j: (0, j)),
        ),
        compiler_params=pltpu.CompilerParams(
            dimension_semantics=("parallel",)),
    )(x_p, wa_weight)
    return out[:B]


# ---------------------------------------------------------------------------
# public API mirroring Attention.forward
# ---------------------------------------------------------------------------
def attention_dot(last_hidden, encoder_outputs):
    """Attention(method='dot').forward(last_hidden, encoder_outputs)."""
    return _attention_softmax(last_hidden, encoder_outputs)


def attention_general(last_hidden, encoder_outputs, wa_weight):
    """Attention(method='general').forward(...); wa_weight is Wa.weight (H,H)."""
    return _attention_softmax(_wa_project(last_hidden, wa_weight),
                              encoder_outputs)


if __name__ == "__main__":
    B, T, H = 2, 8, 32  # batch, max_time, hidden_size
    key = jax.random.PRNGKey(0)
    k1, k2, k3, k4 = jax.random.split(key, 4)

    last_hidden = jax.random.normal(k1, (B, H), dtype=jnp.float32)
    encoder_outputs = jax.random.normal(k2, (B, T, H), dtype=jnp.float32)
    bound = 1.0 / (H ** 0.5)
    wa_weight = jax.random.uniform(k3, (H, H), minval=-bound, maxval=bound,
                                   dtype=jnp.float32)

    def ref_softmax(q, enc):
        return jax.nn.softmax(jnp.einsum("bth,bh->bt", enc, q), axis=-1)

    # --- 'dot' and 'general' at the module's natural small shape ------------
    out_dot = attention_dot(last_hidden, encoder_outputs)
    out_gen = attention_general(last_hidden, encoder_outputs, wa_weight)
    jax.block_until_ready((out_dot, out_gen))

    assert out_dot.shape == (B, T) and out_gen.shape == (B, T)
    assert jnp.allclose(out_dot, ref_softmax(last_hidden, encoder_outputs),
                        atol=1e-4, rtol=1e-3)
    assert jnp.allclose(out_gen,
                        ref_softmax(last_hidden @ wa_weight.T, encoder_outputs),
                        atol=1e-4, rtol=1e-3)

    # --- longer sequence: partial last time tile exercises the boundary mask
    T2 = 600
    enc2 = jax.random.normal(k2, (B, T2, H), dtype=jnp.float32)
    out2 = attention_dot(last_hidden, enc2)
    jax.block_until_ready(out2)
    assert out2.shape == (B, T2)
    assert jnp.allclose(out2, ref_softmax(last_hidden, enc2),
                        atol=1e-4, rtol=1e-3)

    # --- multi-time-tile case: exercises online (m, l) carry + final rescale
    B3, T3, H3 = 4, 5000, 64
    lh3 = jax.random.normal(k4, (B3, H3), dtype=jnp.float32)
    enc3 = jax.random.normal(k2, (B3, T3, H3), dtype=jnp.float32)
    out3 = attention_dot(lh3, enc3)
    jax.block_until_ready(out3)
    assert out3.shape == (B3, T3)
    assert jnp.allclose(out3, ref_softmax(lh3, enc3), atol=1e-6, rtol=2e-3)

    # --- bf16 inputs (halves streamed HBM bytes); softmax math stays f32 ----
    out_bf16 = attention_dot(last_hidden.astype(jnp.bfloat16),
                             encoder_outputs.astype(jnp.bfloat16))
    jax.block_until_ready(out_bf16)
    assert jnp.allclose(out_bf16, ref_softmax(last_hidden, encoder_outputs),
                        atol=3e-2, rtol=3e-2)

    print("KERNEL_OK")
</pallas_src>

<mosaic_0001>
module attributes {stable_mosaic.version = 11 : i64} {
  func.func @_attn_softmax_kernel(%arg0: i32, %arg1: i32, %arg2: memref<1x1x32xf32, #tpu.memory_space<vmem>>, %arg3: memref<1x128x32xf32, #tpu.memory_space<vmem>>, %arg4: memref<1x1x128xf32, #tpu.memory_space<vmem>>, %arg5: memref<1x1xf32, #tpu.memory_space<vmem>>, %arg6: memref<1x1xf32, #tpu.memory_space<vmem>>, %arg7: memref<1x1x1xf32, #tpu.memory_space<vmem>>) attributes {dimension_semantics = [#tpu.dimension_semantics<parallel>, #tpu.dimension_semantics<arbitrary>], iteration_bounds = array<i64: 2, 1>, scalar_prefetch = 0 : i64, scratch_operands = 3 : i64, tpu.core_type = #tpu.core_type<tc>, window_params = [{transform_indices = @transform_0, window_bounds = array<i64: 1, 1, 32>}, {transform_indices = @transform_1, window_bounds = array<i64: 1, 128, 32>}, {transform_indices = @transform_2, window_bounds = array<i64: 1, 1, 128>}]} {
    %c0_i32 = arith.constant 0 : i32
    %0 = arith.cmpi eq, %arg1, %c0_i32 : i32
    %1 = arith.extui %0 : i1 to i32
    %c0_i32_0 = arith.constant 0 : i32
    %2 = arith.cmpi ne, %1, %c0_i32_0 : i32
    scf.if %2 {
      %cst_12 = arith.constant -1.000000e+30 : f32
      %20 = vector.broadcast %cst_12 : f32 to vector<1x1xf32>
      %c0_13 = arith.constant 0 : index
      %c0_14 = arith.constant 0 : index
      %21 = vector.load %arg5[%c0_13, %c0_14] : memref<1x1xf32, #tpu.memory_space<vmem>>, vector<1x1xf32>
      tpu.vector_store %arg5[%c0_13, %c0_14], %20 {strides = array<i32>} : memref<1x1xf32, #tpu.memory_space<vmem>>, vector<1x1xf32>,
      %cst_15 = arith.constant 0.000000e+00 : f32
      %22 = vector.broadcast %cst_15 : f32 to vector<1x1xf32>
      %c0_16 = arith.constant 0 : index
      %c0_17 = arith.constant 0 : index
      %23 = vector.load %arg6[%c0_16, %c0_17] : memref<1x1xf32, #tpu.memory_space<vmem>>, vector<1x1xf32>
      tpu.vector_store %arg6[%c0_16, %c0_17], %22 {strides = array<i32>} : memref<1x1xf32, #tpu.memory_space<vmem>>, vector<1x1xf32>,
    } else {
    }
    %c0 = arith.constant 0 : index
    %c0_1 = arith.constant 0 : index
    %c0_2 = arith.constant 0 : index
    %3 = vector.load %arg2[%c0, %c0_1, %c0_2] : memref<1x1x32xf32, #tpu.memory_space<vmem>>, vector<1x1x32xf32>
    %4 = vector.shape_cast %3 : vector<1x1x32xf32> to vector<1x32xf32>
    %5 = vector.shape_cast %4 : vector<1x32xf32> to vector<1x1x32xf32>
    %c0_3 = arith.constant 0 : index
    %c0_4 = arith.constant 0 : index
    %c0_5 = arith.constant 0 : index
    %6 = vector.load %arg3[%c0_3, %c0_4, %c0_5] : memref<1x128x32xf32, #tpu.memory_space<vmem>>, vector<1x128x32xf32>
    "tpu.trace_start"() <{level = 10 : i32, message = "bqh,bkh->bqk"}> : () -> ()
    %cst = arith.constant dense<0.000000e+00> : vector<1x1x128xf32>
    %7 = tpu.matmul %5, %6, %cst {dimension_numbers = #tpu.dot_dimension_numbers<[2], [2], [1], [1], [0, 0, 0, 1, 1, 1], [0], [0]>} : vector<1x1x32xf32>, vector<1x128x32xf32>, vector<1x1x128xf32> -> vector<1x1x128xf32>
    "tpu.trace_stop"() : () -> ()
    %8 = vector.shape_cast %7 : vector<1x1x128xf32> to vector<1x128xf32>
    %c128_i32 = arith.constant 128 : i32
    %9 = arith.muli %arg1, %c128_i32 : i32
    %10 = tpu.assume_multiple %9, 128 : i32
    %c0_i32_6 = arith.constant 0 : i32
    %11 = arith.cmpi ne, %arg1, %c0_i32_6 : i32
    %12 = arith.extui %11 : i1 to i32
    %c0_i32_7 = arith.constant 0 : i32
    %13 = arith.cmpi ne, %12, %c0_i32_7 : i32
    scf.if %13 {
      %cst_12 = arith.constant dense<0xFF800000> : vector<1xf32>
      %20 = vector.multi_reduction <maximumf>, %8, %cst_12 [1] : vector<1x128xf32> to vector<1xf32>
      %21 = vector.shape_cast %20 : vector<1xf32> to vector<1x1xf32>
      %22 = vector.broadcast %21 : vector<1x1xf32> to vector<1x128xf32>
      %23 = arith.subf %8, %22 : vector<1x128xf32>
      %24 = math.exp %23 : vector<1x128xf32>
      %c0_13 = arith.constant 0 : index
      %c0_14 = arith.constant 0 : index
      %25 = arith.index_cast %10 : i32 to index
      %26 = vector.load %arg4[%c0_13, %c0_14, %25] : memref<1x1x128xf32, #tpu.memory_space<vmem>>, vector<1x1x128xf32>
      %27 = vector.shape_cast %26 : vector<1x1x128xf32> to vector<1x128xf32>
      %28 = vector.shape_cast %24 : vector<1x128xf32> to vector<1x1x128xf32>
      tpu.vector_store %arg4[%c0_13, %c0_14, %25], %28 {strides = array<i32>} : memref<1x1x128xf32, #tpu.memory_space<vmem>>, vector<1x1x128xf32>,
      %29 = arith.index_cast %arg1 : i32 to index
      %c0_15 = arith.constant 0 : index
      %c0_16 = arith.constant 0 : index
      %30 = vector.load %arg7[%29, %c0_15, %c0_16] : memref<1x1x1xf32, #tpu.memory_space<vmem>>, vector<1x1x1xf32>
      %31 = vector.shape_cast %30 : vector<1x1x1xf32> to vector<1x1xf32>
      %32 = vector.shape_cast %21 : vector<1x1xf32> to vector<1x1x1xf32>
      tpu.vector_store %arg7[%29, %c0_15, %c0_16], %32 {strides = array<i32>} : memref<1x1x1xf32, #tpu.memory_space<vmem>>, vector<1x1x1xf32>,
      %c0_17 = arith.constant 0 : index
      %c0_18 = arith.constant 0 : index
      %33 = vector.load %arg5[%c0_17, %c0_18] : memref<1x1xf32, #tpu.memory_space<vmem>>, vector<1x1xf32>
      %34 = arith.maximumf %33, %21 : vector<1x1xf32>
      %c0_19 = arith.constant 0 : index
      %c0_20 = arith.constant 0 : index
      %35 = vector.load %arg6[%c0_19, %c0_20] : memref<1x1xf32, #tpu.memory_space<vmem>>, vector<1x1xf32>
      %c0_21 = arith.constant 0 : index
      %c0_22 = arith.constant 0 : index
      %36 = vector.load %arg5[%c0_21, %c0_22] : memref<1x1xf32, #tpu.memory_space<vmem>>, vector<1x1xf32>
      %37 = arith.subf %36, %34 : vector<1x1xf32>
      %38 = math.exp %37 : vector<1x1xf32>
      %39 = arith.mulf %35, %38 : vector<1x1xf32>
      %40 = arith.subf %21, %34 : vector<1x1xf32>
      %41 = math.exp %40 : vector<1x1xf32>
      %cst_23 = arith.constant dense<0.000000e+00> : vector<1xf32>
      %42 = vector.multi_reduction <add>, %24, %cst_23 [1] : vector<1x128xf32> to vector<1xf32>
      %43 = vector.shape_cast %42 : vector<1xf32> to vector<1x1xf32>
      %44 = arith.mulf %41, %43 : vector<1x1xf32>
      %45 = arith.addf %39, %44 : vector<1x1xf32>
      %c0_24 = arith.constant 0 : index
      %c0_25 = arith.constant 0 : index
      %46 = vector.load %arg6[%c0_24, %c0_25] : memref<1x1xf32, #tpu.memory_space<vmem>>, vector<1x1xf32>
      tpu.vector_store %arg6[%c0_24, %c0_25], %45 {strides = array<i32>} : memref<1x1xf32, #tpu.memory_space<vmem>>, vector<1x1xf32>,
      %c0_26 = arith.constant 0 : index
      %c0_27 = arith.constant 0 : index
      %47 = vector.load %arg5[%c0_26, %c0_27] : memref<1x1xf32, #tpu.memory_space<vmem>>, vector<1x1xf32>
      tpu.vector_store %arg5[%c0_26, %c0_27], %34 {strides = array<i32>} : memref<1x1xf32, #tpu.memory_space<vmem>>, vector<1x1xf32>,
    } else {
    }
    %c0_i32_8 = arith.constant 0 : i32
    %14 = arith.cmpi eq, %arg1, %c0_i32_8 : i32
    %15 = arith.extui %14 : i1 to i32
    %c0_i32_9 = arith.constant 0 : i32
    %16 = arith.cmpi ne, %15, %c0_i32_9 : i32
    scf.if %16 {
      %20 = tpu.iota {dimensions = array<i32: 1>} : vector<1x128xi32>
      %21 = vector.broadcast %10 : i32 to vector<1x128xi32>
      %22 = arith.addi %21, %20 : vector<1x128xi32>
      %c8_i32 = arith.constant 8 : i32
      %23 = vector.broadcast %c8_i32 : i32 to vector<1x128xi32>
      %24 = arith.cmpi slt, %22, %23 : vector<1x128xi32>
      %cst_12 = arith.constant -1.000000e+30 : f32
      %25 = vector.broadcast %cst_12 : f32 to vector<1x128xf32>
      %26 = arith.select %24, %8, %25 : vector<1x128xi1>, vector<1x128xf32>
      %cst_13 = arith.constant dense<0xFF800000> : vector<1xf32>
      %27 = vector.multi_reduction <maximumf>, %26, %cst_13 [1] : vector<1x128xf32> to vector<1xf32>
      %28 = vector.shape_cast %27 : vector<1xf32> to vector<1x1xf32>
      %29 = vector.broadcast %28 : vector<1x1xf32> to vector<1x128xf32>
      %30 = arith.subf %26, %29 : vector<1x128xf32>
      %31 = math.exp %30 : vector<1x128xf32>
      %c0_14 = arith.constant 0 : index
      %c0_15 = arith.constant 0 : index
      %32 = arith.index_cast %10 : i32 to index
      %33 = vector.load %arg4[%c0_14, %c0_15, %32] : memref<1x1x128xf32, #tpu.memory_space<vmem>>, vector<1x1x128xf32>
      %34 = vector.shape_cast %33 : vector<1x1x128xf32> to vector<1x128xf32>
      %35 = vector.shape_cast %31 : vector<1x128xf32> to vector<1x1x128xf32>
      tpu.vector_store %arg4[%c0_14, %c0_15, %32], %35 {strides = array<i32>} : memref<1x1x128xf32, #tpu.memory_space<vmem>>, vector<1x1x128xf32>,
      %36 = arith.index_cast %arg1 : i32 to index
      %c0_16 = arith.constant 0 : index
      %c0_17 = arith.constant 0 : index
      %37 = vector.load %arg7[%36, %c0_16, %c0_17] : memref<1x1x1xf32, #tpu.memory_space<vmem>>, vector<1x1x1xf32>
      %38 = vector.shape_cast %37 : vector<1x1x1xf32> to vector<1x1xf32>
      %39 = vector.shape_cast %28 : vector<1x1xf32> to vector<1x1x1xf32>
      tpu.vector_store %arg7[%36, %c0_16, %c0_17], %39 {strides = array<i32>} : memref<1x1x1xf32, #tpu.memory_space<vmem>>, vector<1x1x1xf32>,
      %c0_18 = arith.constant 0 : index
      %c0_19 = arith.constant 0 : index
      %40 = vector.load %arg5[%c0_18, %c0_19] : memref<1x1xf32, #tpu.memory_space<vmem>>, vector<1x1xf32>
      %41 = arith.maximumf %40, %28 : vector<1x1xf32>
      %c0_20 = arith.constant 0 : index
      %c0_21 = arith.constant 0 : index
      %42 = vector.load %arg6[%c0_20, %c0_21] : memref<1x1xf32, #tpu.memory_space<vmem>>, vector<1x1xf32>
      %c0_22 = arith.constant 0 : index
      %c0_23 = arith.constant 0 : index
      %43 = vector.load %arg5[%c0_22, %c0_23] : memref<1x1xf32, #tpu.memory_space<vmem>>, vector<1x1xf32>
      %44 = arith.subf %43, %41 : vector<1x1xf32>
      %45 = math.exp %44 : vector<1x1xf32>
      %46 = arith.mulf %42, %45 : vector<1x1xf32>
      %47 = arith.subf %28, %41 : vector<1x1xf32>
      %48 = math.exp %47 : vector<1x1xf32>
      %cst_24 = arith.constant dense<0.000000e+00> : vector<1xf32>
      %49 = vector.multi_reduction <add>, %31, %cst_24 [1] : vector<1x128xf32> to vector<1xf32>
      %50 = vector.shape_cast %49 : vector<1xf32> to vector<1x1xf32>
      %51 = arith.mulf %48, %50 : vector<1x1xf32>
      %52 = arith.addf %46, %51 : vector<1x1xf32>
      %c0_25 = arith.constant 0 : index
      %c0_26 = arith.constant 0 : index
      %53 = vector.load %arg6[%c0_25, %c0_26] : memref<1x1xf32, #tpu.memory_space<vmem>>, vector<1x1xf32>
      tpu.vector_store %arg6[%c0_25, %c0_26], %52 {strides = array<i32>} : memref<1x1xf32, #tpu.memory_space<vmem>>, vector<1x1xf32>,
      %c0_27 = arith.constant 0 : index
      %c0_28 = arith.constant 0 : index
      %54 = vector.load %arg5[%c0_27, %c0_28] : memref<1x1xf32, #tpu.memory_space<vmem>>, vector<1x1xf32>
      tpu.vector_store %arg5[%c0_27, %c0_28], %41 {strides = array<i32>} : memref<1x1xf32, #tpu.memory_space<vmem>>, vector<1x1xf32>,
    } else {
    }
    %c0_i32_10 = arith.constant 0 : i32
    %17 = arith.cmpi eq, %arg1, %c0_i32_10 : i32
    %18 = arith.extui %17 : i1 to i32
    %c0_i32_11 = arith.constant 0 : i32
    %19 = arith.cmpi ne, %18, %c0_i32_11 : i32
    scf.if %19 {
      %c0_12 = arith.constant 0 : index
      %c0_13 = arith.constant 0 : index
      %20 = vector.load %arg6[%c0_12, %c0_13] : memref<1x1xf32, #tpu.memory_space<vmem>>, vector<1x1xf32>
      %21 = tpu.reciprocal %20 {approx = true} : vector<1x1xf32> -> vector<1x1xf32>
      %22 = arith.mulf %20, %21 : vector<1x1xf32>
      %cst_14 = arith.constant 2.000000e+00 : f32
      %23 = vector.broadcast %cst_14 : f32 to vector<1x1xf32>
      %24 = arith.subf %23, %22 : vector<1x1xf32>
      %25 = arith.mulf %21, %24 : vector<1x1xf32>
      %c0_15 = arith.constant 0 : index
      %c0_16 = arith.constant 0 : index
      %26 = vector.load %arg5[%c0_15, %c0_16] : memref<1x1xf32, #tpu.memory_space<vmem>>, vector<1x1xf32>
      %c0_i32_17 = arith.constant 0 : i32
      %c128_i32_18 = arith.constant 128 : i32
      %27 = arith.muli %c0_i32_17, %c128_i32_18 : i32
      %28 = tpu.assume_multiple %27, 128 : i32
      %29 = arith.index_cast %c0_i32_17 : i32 to index
      %c0_19 = arith.constant 0 : index
      %c0_20 = arith.constant 0 : index
      %30 = vector.load %arg7[%29, %c0_19, %c0_20] : memref<1x1x1xf32, #tpu.memory_space<vmem>>, vector<1x1x1xf32>
      %31 = vector.shape_cast %30 : vector<1x1x1xf32> to vector<1x1xf32>
      %32 = arith.subf %31, %26 : vector<1x1xf32>
      %33 = math.exp %32 : vector<1x1xf32>
      %34 = arith.mulf %33, %25 : vector<1x1xf32>
      %c0_21 = arith.constant 0 : index
      %c0_22 = arith.constant 0 : index
      %35 = arith.index_cast %28 : i32 to index
      %36 = vector.load %arg4[%c0_21, %c0_22, %35] : memref<1x1x128xf32, #tpu.memory_space<vmem>>, vector<1x1x128xf32>
      %37 = vector.shape_cast %36 : vector<1x1x128xf32> to vector<1x128xf32>
      %38 = vector.broadcast %34 : vector<1x1xf32> to vector<1x128xf32>
      %39 = arith.mulf %37, %38 : vector<1x128xf32>
      %c0_23 = arith.constant 0 : index
      %c0_24 = arith.constant 0 : index
      %40 = arith.index_cast %28 : i32 to index
      %41 = vector.load %arg4[%c0_23, %c0_24, %40] : memref<1x1x128xf32, #tpu.memory_space<vmem>>, vector<1x1x128xf32>
      %42 = vector.shape_cast %41 : vector<1x1x128xf32> to vector<1x128xf32>
      %43 = vector.shape_cast %39 : vector<1x128xf32> to vector<1x1x128xf32>
      tpu.vector_store %arg4[%c0_23, %c0_24, %40], %43 {strides = array<i32>} : memref<1x1x128xf32, #tpu.memory_space<vmem>>, vector<1x1x128xf32>,
      %c1_i32 = arith.constant 1 : i32
    } else {
    }
    return
  }
  func.func @transform_0(%arg0: i32, %arg1: i32) -> (i32, i32, i32) {
    %c0_i32 = arith.constant 0 : i32
    %c0_i32_0 = arith.constant 0 : i32
    %c0_i32_1 = arith.constant 0 : i32
    return %arg0, %c0_i32, %c0_i32_0 : i32, i32, i32
  }
  func.func @transform_1(%arg0: i32, %arg1: i32) -> (i32, i32, i32) {
    %c0_i32 = arith.constant 0 : i32
    %c0_i32_0 = arith.constant 0 : i32
    return %arg0, %arg1, %c0_i32 : i32, i32, i32
  }
  func.func @transform_2(%arg0: i32, %arg1: i32) -> (i32, i32, i32) {
    %c0_i32 = arith.constant 0 : i32
    %c0_i32_0 = arith.constant 0 : i32
    %c0_i32_1 = arith.constant 0 : i32
    return %arg0, %c0_i32, %c0_i32_0 : i32, i32, i32
  }
}

</mosaic_0001>

<bundles_post_ra>
// kernel: tpu_custom_call.1
= control target key start
LH: loop header
LB: loop body
LE: loop exit
PB: predicated region body
PF: predicated region fallthrough
CT: control target
= control target key end

     0   :  { %7 = vsyncpa [#allocation6], 0  ;;  %s1175_s0 = inlined_call_operand.hbm [shape: f32[2,1,32], index: 0, kind: input, shape index: {}]   ;;  %s1176_s1 = inlined_call_operand.hbm [shape: f32[2,8,32], index: 1, kind: input, shape index: {}]   ;;  %s1177_s2 = inlined_call_operand.hbm [shape: f32[2,1,128], index: 2, kind: output, shape index: {}]  }
   0x1   :  { %9 = vsyncpa [#allocation6 + $0x1], 0 }
   0x2   :  { %10 = vsyncpa [#allocation9], 0 }
   0x3   :  { %12 = vsyncpa [#allocation9 + $0x1], 0 }
   0x4   :  { %13 = vsyncpa [#allocation7], 0 }
   0x5   :  { %15 = vsyncpa [#allocation7 + $0x1], 0  ;;  %s930_s9 = smov 0   ;;  %s932_s10 = smov 0  }
   0x6   :  { %s934_s11 = smov 0   ;;  %s936_s12 = smov 0  }
   0x7   :  { %s938_s13 = smov 0   ;;  %s940_s14 = smov 0  }
   0x8 LB: > { %s575_s15 = sadd.s32 4294967295, %s903_s14   ;;  %s576_s16 = sadd.s32 4294967294, %s903_s14   ;;  %s903_s14 = sphi %s940_s14, %s21_s14   ;;  %s899_s13 = sphi %s938_s13, %s1195_s13   ;;  %s895_s12 = sphi %s936_s12, %s1194_s12   ;;  %s891_s11 = sphi %s934_s11, %s1193_s11   ;;  %s887_s10 = sphi %s932_s10, %s1192_s10   ;;  %s883_s9 = sphi %s930_s9, %s1191_s9  }
   0x9   : > { %s33_s17 = sadd.s32 1, %s899_s13  ;;  %s40_s18 = sadd.s32 1, %s891_s11 }
   0xa   : > { %p35_p0 = scmp.ge.s32.totalorder %s33_s17, 2  ;;  %p47_p1 = scmp.ne.s32.totalorder %s891_s11, %s887_s10 }
   0xb   : > { %p48_p2 = scmp.eq.s32.totalorder %s903_s14, 0  ;;  %p53_p3 = scmp.ne.s32.totalorder %s887_s10, %s883_s9 }
   0xc   : > { %s1197_s17 = smov (%p35_p0, %s33_s17), 0  ;;  %p54_p5 = scmp.eq.s32.totalorder %s575_s15, 0 }
   0xd   : > { %p971_p4 = por %p48_p2, %p47_p1  ;;  %s37_s20 = ssub.s32 %s899_s13, %s1197_s17 }
   0xe   : > { %p105_p6 = scmp.eq.s32.totalorder %s575_s15, 1  ;;  %p38_p7 = scmp.eq.s32.totalorder %s37_s20, 0 }
   0xf   : > { %p977_p8 = por %p54_p5, %p53_p3  ;;  %p111_p10 = scmp.eq.s32.totalorder %s576_s16, 1 }
  0x10   : > { %p981_p9 = por %p105_p6, %p47_p1  ;;  %p1178_p12 = scmp.ge.s32.totalorder %s903_s14, 2 }
  0x11   : > { %s1182_s21 = scalar_select %p977_p8, 1, 0 }
  0x12   : > { %s1183_s22 = scalar_select %p981_p9, 1, 0 }
  0x13   : > { %s986_s23 = scalar_select %p38_p7, %s891_s11, %s40_s18  }
  0x14   : > { %p988_p11 = por %p111_p10, %p53_p3  ;;  %127 = sbr.rel (%p1178_p12) target bundleno = 78 (0x4e), region = 16 }
  0x15   : > { %s996_s25 = sand.u32 (!%p1178_p12), 1, %s891_s11   ;;  %s579_s26 = sshll.u32 (!%p1178_p12), %s899_s13, 4 }
  0x16   : > { %s1184_s24 = scalar_select %p988_p11, 1, 0 }
  0x17   : > { %s1002_s29 = scalar_lea.hbm (!%p1178_p12), %s1175_s0, %s579_s26  ;;  %s134_s30 = scalar_lea.vmem (!%p1178_p12), [#allocation5], %s996_s25 }
  0x18   : > { %s141_s3 = sshll.u32 (!%p1178_p12), %s134_s30, 4  ;;  %s132_s4 = scalar_lea.sflag (!%p1178_p12), [#allocation6], %s996_s25  ;;  %s142_s3 = int_to_ptr.vmem [resolvable:$true] %s141_s3 }
  0x19   : > { %s765_s5 = scalar_lea.hbm (!%p1178_p12), %s1002_s29, 16  ;;  %s769_s8 = scalar_lea.hbm (!%p1178_p12), %s1175_s0, 32 }
  0x1a   : > { %p766_p13 = scmp.ne.s32.totalorder (!%p1178_p12), %s1002_s29, %s765_s5  ;;  %p770_p2 = scmp.lt.u32.totalorder (!%p1178_p12), %s1002_s29, %s1175_s0 }
  0x1b   : > { %p771_p3 = scmp.lt.u32.totalorder %s769_s8, %s765_s5  ;;  %p773_p6 = scmp.lt.u32.totalorder %s765_s5, %s1002_s29 }
  0x1c   : > { %p767_p0 = pnand %p766_p13, %p971_p4 }
  0x1d   : > { %p772_p5 = por %p771_p3, %p770_p2 }
  0x1e   : > { %p768_p1 = pneg %p767_p0 }
  0x1f   : > { %p774_p7 = por %p773_p6, %p772_p5 }
  0x21   : > { %p775_p10 = pnand %p774_p7, %p768_p1 }
  0x23   : > { %778 = shalt.err (!%p775_p10)
}
  0x24   : > { %s779_s18 = scalar_lea.vmem %s142_s3, 16  ;;  %s905_s20 = smov [#allocation5]  }
  0x25   : > { %p780_p12 = scmp.ne.s32.totalorder %s142_s3, %s779_s18  ;;  %s783_s26 = sshll.u32 %s905_s20, 4  ;;  %s784_s26 = int_to_ptr.vmem [resolvable:$false] %s783_s26 }
  0x26   : > { %s785_s27 = scalar_lea.vmem %s784_s26, 32  ;;  %p786_p11 = scmp.lt.s32.totalorder %s142_s3, %s784_s26 }
  0x27   : > { %p781_p13 = pnand %p780_p12, %p971_p4  ;;  %p787_p9 = scmp.lt.s32.totalorder %s785_s27, %s779_s18 }
  0x29   : > { %p782_p0 = pneg %p781_p13  ;;  %p788_p8 = por %p787_p9, %p786_p11 }
  0x2b   : > { %p789_p2 = pnand %p788_p8, %p782_p0 }
  0x2d   : > { %792 = shalt.err (!%p789_p2)
}
  0x2e   : > { %688 = dma.hbm_to_vmem [thread:$0]  (%p971_p4), %s1002_s29, 16, %s142_s3, %s132_s4  }
  0x2f   : > { %147 = sbr.rel (!%p971_p4) target bundleno = 78 (0x4e), region = 24  ;;  %s580_s28 = sshll.u32 (%p971_p4), %s996_s25, 7 }
  0x30   : > { %s149_s30 = scalar_lea.sflag (%p971_p4), [#allocation9], %s996_s25  ;;  %s152_s5 = scalar_lea.vmem (%p971_p4), [#allocation8], %s580_s28 }
  0x36   : > { %158 = vsyncadd %s149_s30, 1920  ;;  %s581_s6 = sshll.u32 %s899_s13, 7  ;;  %s164_s7 = sshll.u32 %s152_s5, 4  ;;  %s165_s7 = int_to_ptr.vmem [resolvable:$true] %s164_s7 }
  0x37   : > { %s1033_s16 = scalar_lea.hbm %s1176_s1, %s581_s6  ;;  %s795_s4 = scalar_lea.hbm %s1176_s1, 256 }
  0x38   : > { %s793_s19 = scalar_lea.hbm %s1033_s16, 128  ;;  %p796_p8 = scmp.lt.u32.totalorder %s1033_s16, %s1176_s1 }
  0x39   : > { %p794_p4 = scmp.ne.s32.totalorder %s1033_s16, %s793_s19  ;;  %p797_p9 = scmp.lt.u32.totalorder %s795_s4, %s793_s19 }
  0x3a   : > { %p799_p12 = scmp.lt.u32.totalorder %s793_s19, %s1033_s16 }
  0x3b   : > { %p798_p11 = por %p797_p9, %p796_p8 }
  0x3d   : > { %p800_p1 = por %p799_p12, %p798_p11 }
  0x3f   : > { %p801_p3 = pnand %p800_p1, %p794_p4 }
  0x41   : > { %804 = shalt.err (!%p801_p3)
}
  0x42   : > { %s805_s26 = scalar_lea.vmem %s165_s7, 128  ;;  %s906_s27 = smov [#allocation8]  }
  0x43   : > { %p806_p5 = scmp.ne.s32.totalorder %s165_s7, %s805_s26  ;;  %s807_s28 = sshll.u32 %s906_s27, 4  ;;  %s808_s28 = int_to_ptr.vmem [resolvable:$false] %s807_s28 }
  0x44   : > { %s809_s5 = scalar_lea.vmem %s808_s28, 4096  ;;  %p810_p6 = scmp.lt.s32.totalorder %s165_s7, %s808_s28 }
  0x45   : > { %p811_p7 = scmp.lt.s32.totalorder %s809_s5, %s805_s26 }
  0x47   : > { %p812_p10 = por %p811_p7, %p810_p6 }
  0x49   : > { %p813_p13 = pnand %p812_p10, %p806_p5 }
  0x4b   : > { %816 = shalt.err (!%p813_p13)
}
  0x4c   : > { %s907_s6 = smov 128   ;;  %s908_s8 = smov 8  }
  0x4d   : > { %170 = dma.hbm_to_vmem [thread:$0]  %s1033_s16, 128, %s165_s7, %s149_s30, %s907_s6, %s907_s6, %s908_s8  }
  0x4e PF: > { %p582_p0 = scmp.ge.s32.totalorder %s903_s14, 1  ;;  %p172_p2 = scmp.lt.s32.totalorder %s903_s14, 3 }
  0x50   : > { %p173_p4 = pnand %p582_p0, %p172_p2 }
  0x51   : > { %s1051_s15 = sand.u32 (!%p173_p4), 1, %s887_s10   ;;  %p1185_p8 = scmp.ne.s32.totalorder (!%p173_p4), %s1182_s21, 0 }
  0x52   : > { %176 = sbr.rel (%p173_p4) target bundleno = 852 (0x354), region = 28  ;;  %s179_s19 = scalar_lea.sflag (!%p173_p4), [#allocation6], %s1051_s15 }
  0x53   : > { %s181_s29 = scalar_lea.vmem (!%p173_p4), [#allocation5], %s1051_s15 }
  0x59   : > { %870 = dma.done.wait (%p1185_p8), %s179_s19, 16  }
  0x5a   : > { %872 = vsyncadd (%p1185_p8), %s179_s19, 4294967280  ;;  %s583_s25 = sshll.u32 %s1051_s15, 7  ;;  %s187_s30 = scalar_lea.sflag [#allocation9], %s1051_s15 }
  0x5b   : > { %s1061_s7 = scalar_lea.vmem [#allocation8], %s583_s25 }
  0x5c   : > { %874 = dma.done.wait (%p1185_p8), %s187_s30, 2048  }
  0x5d   : > { %876 = vsyncadd (%p1185_p8), %s187_s30, 4294965248  ;;  %vm221_vm0 = vcmask 0   ;;  %v909_v0 = vmov 0.0|0.0   ;;  %v910_v1 = vmov -1e+30   ;;  %v911_v2 = vmov 0.0  }
  0x5e   : > { %656 = vmatprep.subr.bf16.mxu0 %v909_v0  ;;  %222 = vst.msk [vmem:[#allocation2] sm:$0x1] %vm221_vm0, %v910_v1  ;;  %223 = vst.msk [vmem:[#allocation3] sm:$0x1] %vm221_vm0, %v911_v2  ;;  %vm912_vm1 = vmmov 0   ;;  %vm241_vm2 = vcmask 261120   ;;  %v402_v29 = vlaneseq }
  0x5f   : > { %653 = vmatprep.mubr.msk.f32.mxu0 %vm912_vm1, %v911_v2  ;;  %v225_v3 = vld [vmem:[%s1061_s7] sm:$0xff]  ;;  %v226_v4 = vld [vmem:[%s1061_s7 + $0x8] sm:$0xff]  ;;  %vm1073_vm3 = vmpackc.low %vm241_vm2, %vm241_vm2  ;;  %vm408_vm5 = vcmask 1040384   ;;  %s1115_s21 = scalar_lea.vmem [#allocation10], %s1051_s15  ;;  %v913_v43 = vmov 0   ;;  %s601_s16 = sshll.u32 %s895_s12, 4 }
  0x60   : > { %v657_v6 = vpack.c.bf16 %v226_v4, %v225_v3  ;;  %v227_v7 = vld [vmem:[%s1061_s7 + $0x10] sm:$0xff]  ;;  %v228_v8 = vld [vmem:[%s1061_s7 + $0x18] sm:$0xff]  ;;  %v229_v10 = vld [vmem:[%s1061_s7 + $0x20] sm:$0xff]  ;;  %v403_v30 = vand.u32 127, %v402_v29  ;;  %753 = vset.pattern.permute.xlu1 %v913_v43  ;;  %754 = vset.pattern.permute.xlu0 %v913_v43  ;;  %v457_v1 = vshrl.u32 %v402_v29, 7  ;;  %s475_s3 = sshll.u32 %s1115_s21, 4  ;;  %s1125_s20 = scalar_lea.hbm %s1177_s2, %s601_s16  ;;  %s1127_s3 = int_to_ptr.vmem [resolvable:$true] %s475_s3 }
  0x61   : > { %v661_v9 = vpack.c.bf16 %v228_v8, %v227_v7  ;;  %v230_v11 = vld [vmem:[%s1061_s7 + $0x28] sm:$0xff]  ;;  %v231_v13 = vld [vmem:[%s1061_s7 + $0x30] sm:$0xff]  ;;  %v232_v14 = vld [vmem:[%s1061_s7 + $0x38] sm:$0xff]  ;;  %s463_s26 = scalar_lea.sflag [#allocation7], %s1051_s15  ;;  %s817_s27 = scalar_lea.vmem %s1127_s3, 16 }
  0x62   : > { %659 = vmatpush3.bf16.xpose.msk.msra.mxu0 %vm1073_vm3, %v657_v6  ;;  %v665_v12 = vpack.c.bf16 %v230_v11, %v229_v10  ;;  %v669_v15 = vpack.c.bf16 %v232_v14, %v231_v13  ;;  %v233_v16 = vld [vmem:[%s1061_s7 + $0x40] sm:$0xff]  ;;  %v234_v17 = vld [vmem:[%s1061_s7 + $0x48] sm:$0xff]  ;;  %v235_v19 = vld [vmem:[%s1061_s7 + $0x50] sm:$0xff]  ;;  %vm406_vm4 = vcmp.lt.s32.totalorder %v403_v30, 8  ;;  %v458_v2 = vsub.s32 0, %v457_v1  ;;  %p818_p9 = scmp.ne.s32.totalorder %s1127_s3, %s817_s27  ;;  %p1188_p11 = scmp.ne.s32.totalorder %s1183_s22, 0 }
  0x63   : > { %660 = vmatprep.subr.bf16.mxu0 %v909_v0  ;;  %v673_v18 = vpack.c.bf16 %v234_v17, %v233_v16  ;;  %v236_v20 = vld [vmem:[%s1061_s7 + $0x58] sm:$0xff]  ;;  %v237_v22 = vld [vmem:[%s1061_s7 + $0x60] sm:$0xff]  ;;  %v238_v23 = vld [vmem:[%s1061_s7 + $0x68] sm:$0xff]  ;;  %s914_s12 = smov [#allocation10]  }
  0x64   : > { %v677_v21 = vpack.c.bf16 %v236_v20, %v235_v19  ;;  %v681_v24 = vpack.c.bf16 %v238_v23, %v237_v22  ;;  %v239_v25 = vld [vmem:[%s1061_s7 + $0x70] sm:$0xff]  ;;  %v240_v26 = vld [vmem:[%s1061_s7 + $0x78] sm:$0xff]  ;;  %p819_p12 = pnand %p818_p9, %p1188_p11  ;;  %s821_s28 = sshll.u32 %s914_s12, 4  ;;  %s822_s28 = int_to_ptr.vmem [resolvable:$false] %s821_s28 }
  0x65   : > { %v685_v27 = vpack.c.bf16 %v240_v26, %v239_v25  ;;  %v224_v28 = vld [vmem:[%s181_s29] sm:$0x1]  ;;  %v424_v48 = vld [vmem:[#allocation3] sm:$0x1]  ;;  %s823_s5 = scalar_lea.vmem %s822_s28, 32  ;;  %p824_p3 = scmp.lt.s32.totalorder %s1127_s3, %s822_s28 }
  0x66   : > { %v422_v35 = vld [vmem:[#allocation2] sm:$0x1]  ;;  %p820_p1 = pneg %p819_p12  ;;  %p825_p5 = scmp.lt.s32.totalorder %s823_s5, %s817_s27 }
  0x68   : > { %p826_p6 = por %p825_p5, %p824_p3 }
  0x6a   : > { %663 = vmatpush3.bf16.xpose.msk.msra.mxu0 %vm1073_vm3, %v661_v9  ;;  %p827_p7 = pnand %p826_p6, %p820_p1 }
  0x6b   : > { %664 = vmatprep.subr.bf16.mxu0 %v909_v0 }
  0x72   : > { %667 = vmatpush3.bf16.xpose.msk.msra.mxu0 %vm1073_vm3, %v665_v12 }
  0x73   : > { %668 = vmatprep.subr.bf16.mxu0 %v909_v0 }
  0x7a   : > { %671 = vmatpush3.bf16.xpose.msk.msra.mxu0 %vm1073_vm3, %v669_v15 }
  0x7b   : > { %672 = vmatprep.subr.bf16.mxu0 %v909_v0 }
  0x82   : > { %675 = vmatpush3.bf16.xpose.msk.msra.mxu0 %vm1073_vm3, %v673_v18 }
  0x83   : > { %676 = vmatprep.subr.bf16.mxu0 %v909_v0 }
  0x8a   : > { %679 = vmatpush3.bf16.xpose.msk.msra.mxu0 %vm1073_vm3, %v677_v21 }
  0x8b   : > { %680 = vmatprep.subr.bf16.mxu0 %v909_v0 }
  0x92   : > { %683 = vmatpush3.bf16.xpose.msk.msra.mxu0 %vm1073_vm3, %v681_v24 }
  0x93   : > { %684 = vmatprep.subr.bf16.mxu0 %v909_v0 }
  0x9a   : > { %687 = vmatpush3.bf16.xpose.msk.msra.mxu0 %vm1073_vm3, %v685_v27 }
  0xa1   : > { %654 = vmatmul.mubr.msk.f32.vlgmr.msra.gmra.mrb[0].mxu0 %vm241_vm2, %v224_v28 }
 0x174   : > { %v359_v31 = vpop.f32.mrb[0].mxu0 }
 0x175   : > { %v407_v32 = vsel %vm406_vm4, %v359_v31, -1e+30  ;;  %v655_v33 = vpop.f32.mrb[1].mxu0 }
 0x176   : > { %v409_v34 = vsel %vm408_vm5, %v407_v32, -inf }
 0x177   : > { %410 = vmax.xlane.f32.xlu0 %v409_v34 }
 0x204   : > { %v411_v36 = vpop.xlane.xlu0 %410 }
 0x205   : > { %v412_v37 = vsub.f32 %v407_v32, %v411_v36  ;;  %421 = vst.msk [vmem:[#allocation4] sm:$0x1] %vm221_vm0, %v411_v36  ;;  %v423_v38 = vmax.f32 %v422_v35, %v411_v36 }
 0x207   : > { %v413_v39 = vmul.f32 1.442695, %v412_v37  ;;  %v425_v40 = vsub.f32 %v422_v35, %v423_v38  ;;  %438 = vst.msk [vmem:[#allocation2] sm:$0x1] %vm221_vm0, %v423_v38  ;;  %v429_v44 = vsub.f32 %v411_v36, %v423_v38 }
 0x209   : > { %755 = vpow2.f32 %v413_v39  ;;  %v426_v45 = vmul.f32 1.442695, %v425_v40  ;;  %v430_v46 = vmul.f32 1.442695, %v429_v44 }
 0x20b   : > { %757 = vpow2.f32 %v426_v45 }
 0x20c   : > { %759 = vpow2.f32 %v430_v46  ;;  %v445_v55 = vld [vmem:[#allocation4] sm:$0x1] }
 0x20e   : > { %v444_v54 = vld [vmem:[#allocation2] sm:$0x1] }
 0x20f   : > { %v446_v56 = vsub.f32 %v445_v55, %v444_v54 }
 0x211   : > { %v447_v58 = vmul.f32 1.442695, %v446_v56 }
 0x213   : > { %v756_v41 = vpop.eup %755 }
 0x214   : > { %v432_v42 = vsel %vm408_vm5, %v756_v41, 0.0  ;;  %418 = vst [vmem:[%s1115_s21] sm:$0x1] %v756_v41 }
 0x215   : > { %433 = vadd.xlane.f32.xlu0 %v432_v42  ;;  %v758_v47 = vpop.eup %757 }
 0x216   : > { %v760_v49 = vpop.eup %759  ;;  %v428_v51 = vmul.f32 %v758_v47, %v424_v48 }
 0x21b   : > { %v450_v5 = vld [vmem:[%s1115_s21] sm:$0x1] }
 0x2a2   : > { %v434_v50 = vpop.xlane.xlu0 %433 }
 0x2a3   : > { %v435_v52 = vmul.f32 %v760_v49, %v434_v50 }
 0x2a5   : > { %v436_v53 = vadd.f32 %v435_v52, %v428_v51 }
 0x2a7   : > { %437 = vst.msk [vmem:[#allocation3] sm:$0x1] %vm221_vm0, %v436_v53 }
 0x2ae   : > { %v439_v57 = vld [vmem:[#allocation3] sm:$0x1] }
 0x2af   : > { %761 = vrcp.f32 %v439_v57 }
 0x2b0   : > { %763 = vpow2.f32 %v447_v58 }
 0x2b9   : > { %v762_v59 = vpop.eup %761 }
 0x2ba   : > { %v441_v60 = vmul.f32 %v762_v59, %v439_v57  ;;  %v764_v63 = vpop.eup %763 }
 0x2bc   : > { %v442_v61 = vsub.f32 2.0, %v441_v60 }
 0x2be   : > { %v443_v62 = vmul.f32 %v762_v59, %v442_v61 }
 0x2c0   : > { %v449_v0 = vmul.f32 %v764_v63, %v443_v62 }
 0x2c2   : > { %453 = vperm.xlu1 %753, %v449_v0  }
 0x341   : > { %v454_v3 = vpop.permute.xlu1 %453 }
 0x342   : > { %v459_v4 = vrot.slane %v454_v3, %v458_v2 }
 0x344   : > { %v460_v6 = vmul.f32 %v459_v4, %v450_v5 }
 0x346   : > { %461 = vst [vmem:[%s1115_s21] sm:$0x1] %v460_v6 }
 0x347   : > { %830 = shalt.err (!%p827_p7)
}
 0x348   : > { %s831_s6 = scalar_lea.hbm %s1125_s20, 16  ;;  %s835_s19 = scalar_lea.hbm %s1177_s2, 32 }
 0x349   : > { %p832_p10 = scmp.ne.s32.totalorder %s1125_s20, %s831_s6  ;;  %p836_p2 = scmp.lt.u32.totalorder %s1125_s20, %s1177_s2 }
 0x34a   : > { %p837_p4 = scmp.lt.u32.totalorder %s835_s19, %s831_s6  ;;  %p839_p9 = scmp.lt.u32.totalorder %s831_s6, %s1125_s20 }
 0x34b   : > { %p833_p13 = pnand %p832_p10, %p1188_p11 }
 0x34c   : > { %p838_p8 = por %p837_p4, %p836_p2 }
 0x34d   : > { %p834_p0 = pneg %p833_p13 }
 0x34e   : > { %p840_p12 = por %p839_p9, %p838_p8 }
 0x350   : > { %p841_p1 = pnand %p840_p12, %p834_p0 }
 0x352   : > { %844 = shalt.err (!%p841_p1)
}
 0x353   : > { %691 = dma.vmem_to_hbm [thread:$0]  (%p1188_p11), %s1127_s3, 16, %s1125_s20, %s463_s26  }
 0x354 PF: > { %s487_s30 = sand.u32 1, %s883_s9   ;;  %p1189_p3 = scmp.ne.s32.totalorder %s1184_s24, 0 }
 0x355   : > { %p1190_p5 = scmp.ge.s32.totalorder %s903_s14, 2  ;;  %s488_s7 = scalar_lea.sflag [#allocation7], %s487_s30 }
 0x357   : > { %p694_p6 = pnand %p1190_p5, %p1189_p3 }
 0x359   : > { %878 = dma.done.wait (!%p694_p6), %s488_s7, 16  }
 0x35a   : > { %880 = vsyncadd (!%p694_p6), %s488_s7, 4294967280  ;;  %s21_s14 = sadd.s32 1, %s903_s14   ;;  %s1191_s9 = smov %s887_s10 }
 0x35b   : > { %p18_p7 = scmp.ge.s32.totalorder %s21_s14, 4   ;;  %s1192_s10 = smov %s891_s11 }
 0x35c   : > { %s1193_s11 = smov %s986_s23  ;;  %s1194_s12 = smov %s899_s13 }
 0x35d   : > { %s1195_s13 = smov %s1197_s17  ;;  %20 = sbr.rel (!%p18_p7) target bundleno = 8 (0x8), region = 102 }
 0x364   :  { %492 = vsyncpa [#allocation6], 1 }
 0x365   :  { %494 = vsyncpa [#allocation6 + $0x1], 1 }
 0x366   :  { %495 = vsyncpa [#allocation9], 1 }
 0x367   :  { %497 = vsyncpa [#allocation9 + $0x1], 1 }
 0x368   :  { %498 = vsyncpa [#allocation7], 1 }
 0x369   :  { %500 = vsyncpa [#allocation7 + $0x1], 1 }

</bundles_post_ra>
